<compile_context>
chip_gen: v5e
topology: v5e:2x2
jax: 0.10.0
libtpu: 0.0.40
codegen_flags: <defaults>
</compile_context>

<pallas_src>
import jax
import jax.numpy as jnp
from jax.experimental import pallas as pl
from jax.experimental.pallas import tpu as pltpu


def _norm_kernel(x_ref, scale_ref, bias_ref, o_ref):
    # x_ref / o_ref: (TR, TL) VMEM tile of the flattened (N*C, H*W) image.
    # scale_ref / bias_ref: (TR, 1) per-row FMA coefficients, broadcast over lanes.
    o_ref[...] = x_ref[...] * scale_ref[...] + bias_ref[...]


def normalize(img, mean, std, *, block_rows=256, block_cols=2048):
    """(img - mean[:, None, None]) / std[:, None, None] for NCHW `img`."""
    N, C, H, W = img.shape
    assert mean.shape == (C,) and std.shape == (C,)
    R, L = N * C, H * W

    # Free reshape of contiguous NCHW -> lane-dense 2-D slab.
    x2d = img.reshape(R, L)

    # Fused multiply-add coefficients: y = x * (1/std) + (-mean/std).
    inv_std = (1.0 / std.astype(jnp.float32))
    bias = (-mean.astype(jnp.float32) * inv_std)
    # Row r of the flattened slab corresponds to channel r % C.
    scale_rows = jnp.tile(inv_std.astype(img.dtype), N)[:, None]  # (N*C, 1)
    bias_rows = jnp.tile(bias.astype(img.dtype), N)[:, None]      # (N*C, 1)

    # Tile sizes: either the full extent (small arrays) or aligned tiles
    # (block_rows multiple of 8, block_cols multiple of 128, ~2 MiB f32 each).
    tr = R if R <= block_rows else block_rows
    tl = L if L <= block_cols else block_cols
    grid = (pl.cdiv(R, tr), pl.cdiv(L, tl))

    out2d = pl.pallas_call(
        _norm_kernel,
        out_shape=jax.ShapeDtypeStruct((R, L), img.dtype),
        grid=grid,
        in_specs=[
            pl.BlockSpec((tr, tl), lambda i, j: (i, j)),
            pl.BlockSpec((tr, 1), lambda i, j: (i, 0)),
            pl.BlockSpec((tr, 1), lambda i, j: (i, 0)),
        ],
        out_specs=pl.BlockSpec((tr, tl), lambda i, j: (i, j)),
        compiler_params=pltpu.CompilerParams(
            dimension_semantics=("parallel", "parallel")
        ),
    )(x2d, scale_rows, bias_rows)

    return out2d.reshape(N, C, H, W)


if __name__ == "__main__":
    N, C, H, W = 2, 4, 16, 16

    key = jax.random.PRNGKey(0)
    img = jax.random.uniform(key, (N, C, H, W), dtype=jnp.float32)

    # Deterministic per-channel mean / std (ImageNet-like, padded to C=4).
    mean = jnp.array([0.485, 0.456, 0.406, 0.500], dtype=jnp.float32)
    std = jnp.array([0.229, 0.224, 0.225, 0.250], dtype=jnp.float32)

    out = normalize(img, mean, std)
    out = jax.block_until_ready(out)

    # Reference check (pure JAX, same broadcasting as PyTorch (-1,1,1) view).
    # FMA (x*inv_std - mean*inv_std) differs from the divide by a few ulp.
    ref = (img - mean[None, :, None, None]) / std[None, :, None, None]
    assert out.shape == (N, C, H, W)
    assert jnp.allclose(out, ref, atol=1e-5, rtol=1e-5)

    print("KERNEL_OK")
</pallas_src>

<mosaic_0001>
module attributes {stable_mosaic.version = 11 : i64} {
  func.func @_norm_kernel(%arg0: i32, %arg1: i32, %arg2: memref<8x256xf32, #tpu.memory_space<vmem>>, %arg3: memref<8x1xf32, #tpu.memory_space<vmem>>, %arg4: memref<8x1xf32, #tpu.memory_space<vmem>>, %arg5: memref<8x256xf32, #tpu.memory_space<vmem>>) attributes {dimension_semantics = [#tpu.dimension_semantics<parallel>, #tpu.dimension_semantics<parallel>], iteration_bounds = array<i64: 1, 1>, scalar_prefetch = 0 : i64, scratch_operands = 0 : i64, tpu.core_type = #tpu.core_type<tc>, window_params = [{transform_indices = @transform_0, window_bounds = array<i64: 8, 256>}, {transform_indices = @transform_1, window_bounds = array<i64: 8, 1>}, {transform_indices = @transform_2, window_bounds = array<i64: 8, 1>}, {transform_indices = @transform_3, window_bounds = array<i64: 8, 256>}]} {
    %c0 = arith.constant 0 : index
    %c0_0 = arith.constant 0 : index
    %0 = vector.load %arg2[%c0, %c0_0] : memref<8x256xf32, #tpu.memory_space<vmem>>, vector<8x256xf32>
    %c0_1 = arith.constant 0 : index
    %c0_2 = arith.constant 0 : index
    %1 = vector.load %arg3[%c0_1, %c0_2] : memref<8x1xf32, #tpu.memory_space<vmem>>, vector<8x1xf32>
    %2 = vector.broadcast %1 : vector<8x1xf32> to vector<8x256xf32>
    %3 = arith.mulf %0, %2 : vector<8x256xf32>
    %c0_3 = arith.constant 0 : index
    %c0_4 = arith.constant 0 : index
    %4 = vector.load %arg4[%c0_3, %c0_4] : memref<8x1xf32, #tpu.memory_space<vmem>>, vector<8x1xf32>
    %5 = vector.broadcast %4 : vector<8x1xf32> to vector<8x256xf32>
    %6 = arith.addf %3, %5 : vector<8x256xf32>
    %c0_5 = arith.constant 0 : index
    %c0_6 = arith.constant 0 : index
    %7 = vector.load %arg5[%c0_5, %c0_6] : memref<8x256xf32, #tpu.memory_space<vmem>>, vector<8x256xf32>
    tpu.vector_store %arg5[%c0_5, %c0_6], %6 {strides = array<i32>} : memref<8x256xf32, #tpu.memory_space<vmem>>, vector<8x256xf32>,
    return
  }
  func.func @transform_0(%arg0: i32, %arg1: i32) -> (i32, i32) {
    %c0_i32 = arith.constant 0 : i32
    return %arg0, %arg1 : i32, i32
  }
  func.func @transform_1(%arg0: i32, %arg1: i32) -> (i32, i32) {
    %c0_i32 = arith.constant 0 : i32
    %c0_i32_0 = arith.constant 0 : i32
    return %arg0, %c0_i32 : i32, i32
  }
  func.func @transform_2(%arg0: i32, %arg1: i32) -> (i32, i32) {
    %c0_i32 = arith.constant 0 : i32
    %c0_i32_0 = arith.constant 0 : i32
    return %arg0, %c0_i32 : i32, i32
  }
  func.func @transform_3(%arg0: i32, %arg1: i32) -> (i32, i32) {
    %c0_i32 = arith.constant 0 : i32
    return %arg0, %arg1 : i32, i32
  }
}

</mosaic_0001>

<bundles_post_ra>
// kernel: tpu_custom_call.1
= control target key start
LH: loop header
LB: loop body
LE: loop exit
PB: predicated region body
PF: predicated region fallthrough
CT: control target
= control target key end

     0   :  { %s117_s0 = inlined_call_operand.vmem [shape: f32[8,256], index: 0, kind: input, shape index: {}]   ;;  %s118_s1 = inlined_call_operand.vmem [shape: f32[8,1], index: 1, kind: input, shape index: {}]   ;;  %s119_s2 = inlined_call_operand.vmem [shape: f32[8,1], index: 2, kind: input, shape index: {}]   ;;  %s120_s3 = inlined_call_operand.hbm [shape: f32[8,256], index: 3, kind: output, shape index: {}]  }
   0x1   :  { %v17_v0 = vld [vmem:[%s118_s1] sm:$0xff] }
   0x2   :  { %8 = vsyncpa [#allocation3], 0  ;;  %v80_v1 = vmov 0   ;;  %v25_v2 = vld [vmem:[%s119_s2] sm:$0xff]  ;;  %v16_v5 = vld [vmem:[%s117_s0 + $0x8] sm:$0xff]  ;;  %s81_s1 = smov [#allocation2]  }
   0x3   :  { %53 = vset.pattern.permute.xlu0 %v80_v1  ;;  %v15_v4 = vld [vmem:[%s117_s0] sm:$0xff]  ;;  %s40_s20 = sshll.u32 %s81_s1, 4  ;;  %s42_s23 = sshll.u32 %s120_s3, 4  ;;  %s41_s20 = int_to_ptr.vmem [resolvable:$true] %s40_s20  ;;  %s43_s23 = int_to_ptr.hbm [resolvable:$true] %s42_s23 }
   0x4   :  { %20 = vperm.xlu0 %53, %v17_v0  }
   0xc   :  { %28 = vperm.xlu0 %53, %v25_v2  }
  0x76   :  { %v21_v3 = vpop.permute.xlu0 %20 }
  0x77   :  { %v23_v6 = vmul.f32 %v21_v3, %v15_v4  ;;  %v24_v7 = vmul.f32 %v21_v3, %v16_v5 }
  0x7e   :  { %v29_v8 = vpop.permute.xlu0 %28 }
  0x7f   :  { %v31_v9 = vadd.f32 %v29_v8, %v23_v6  ;;  %v32_v10 = vadd.f32 %v29_v8, %v24_v7 }
  0x81   :  { %33 = vst [vmem:[#allocation2] sm:$0xff] %v31_v9 }
  0x82   :  { %34 = vst [vmem:[#allocation2 + $0x8] sm:$0xff] %v32_v10 }
  0x83   :  { %45 = dma.vmem_to_hbm [thread:$0]  %s41_s20, 256, %s43_s23, [#allocation3]  }
  0x84   :  { %78 = dma.done.wait [#allocation3], 256  }
  0x85   :  { %79 = vsyncadd [#allocation3], 4294967040 }
  0x86   :  { %50 = vsyncpa [#allocation3], 1 }

</bundles_post_ra>
